<compile_context>
chip_gen: v7x
topology: tpu7x:2x2x1
jax: 0.10.0
libtpu: 0.0.40
codegen_flags: <defaults>
</compile_context>

<pallas_src>
import functools

import jax
import jax.numpy as jnp
from jax.experimental import pallas as pl
from jax.experimental.pallas import tpu as pltpu

T_MAX = 1.0
_LANE = 128
_SUBLANE = 8


def _round_up(n, m):
    return ((n + m - 1) // m) * m


def _inversed_dynamics_kernel(t_ref, x_ref, w1_ref, b1_ref, bt_ref,
                              w2_ref, b2_ref, out_ref, *, d_actual, t_max):
    # time reversal: evaluate the wrapped dynamics at (t_max - t)
    t_rev = t_max - t_ref[0]

    x_bf = x_ref[...]                                   # bf16 [TB, D_in]
    w1_bf = w1_ref[...]                                 # bf16 [D_in, H_pad]
    w2_bf = w2_ref[...]                                 # bf16 [H_pad, OUT_W]

    # h = tanh(x @ W1 + b1 + t_rev * bt)   (MXU in bf16, f32 accumulation)
    pre = (jnp.dot(x_bf, w1_bf, preferred_element_type=jnp.float32)
           + b1_ref[...] + t_rev * bt_ref[...])         # f32 [TB, H_pad]
    h = jnp.tanh(pre)                                   # f32 [TB, H_pad]

    # dx = h @ W2 + b2  (padded columns of W2/b2 are zero -> dx is 0 there)
    dx = (jnp.dot(h.astype(jnp.bfloat16), w2_bf,
                  preferred_element_type=jnp.float32)
          + b2_ref[...])                                # f32 [TB, OUT_W]

    # exact Jacobian trace of dx w.r.t. x, in f32:
    #   s[k] = sum_i W1[i,k] * W2[k,i]  (computed from the resident weight tiles)
    d_in = w1_bf.shape[0]
    w1_f = w1_bf.astype(jnp.float32)                    # [D_in, H_pad]
    w2_f = w2_bf[:, :d_in].astype(jnp.float32)          # [H_pad, D_in]
    s = jnp.sum(w1_f * w2_f.T, axis=0, keepdims=True)   # [1, H_pad]
    trace = jnp.sum((1.0 - h * h) * s, axis=-1, keepdims=True)  # [TB, 1]

    # Pack (-dx, -trace) lane-dense: column `d_actual` (which is exactly zero in dx
    # because the corresponding W2/b2 pad columns are zero) carries the trace.
    lane = jax.lax.broadcasted_iota(jnp.int32, (1, out_ref.shape[1]), 1)
    trace_mask = (lane == d_actual).astype(jnp.float32)         # [1, OUT_W]
    out_ref[...] = -(dx + trace * trace_mask)


def inversed_dynamics(t, x, w1, b1, bt, w2, b2, *, t_max=T_MAX):
    """Returns [-dx, -trace] of the wrapped dynamics evaluated at (t_max - t)."""
    B, D = x.shape
    H = w1.shape[1]

    D_in = _round_up(D, _LANE)            # x / W1-row padding (lane-aligned)
    H_pad = _round_up(H, _LANE)           # hidden padding
    OUT_W = _round_up(D + 1, _LANE)       # packed output: D dx columns + 1 trace col

    # Batch tile: largest reasonable tile, re-derived conservatively so the
    # resident weights + double-buffered x/out tiles stay well under v7x's 64 MiB.
    TB = min(_round_up(B, _SUBLANE), 512)
    B_pad = _round_up(B, TB)
    nb = B_pad // TB

    f32 = jnp.float32
    bf16 = jnp.bfloat16

    # Zero-pad to lane/sublane aligned shapes; MXU operands in bf16, biases in f32.
    xp = jnp.zeros((B_pad, D_in), bf16).at[:B, :D].set(x.astype(bf16))
    w1p = jnp.zeros((D_in, H_pad), bf16).at[:D, :H].set(w1.astype(bf16))
    w2p = jnp.zeros((H_pad, OUT_W), bf16).at[:H, :D].set(w2.astype(bf16))
    b1p = jnp.zeros((1, H_pad), f32).at[0, :H].set(b1.astype(f32))
    btp = jnp.zeros((1, H_pad), f32).at[0, :H].set(bt.astype(f32))
    b2p = jnp.zeros((1, OUT_W), f32).at[0, :D].set(b2.astype(f32))

    t_arr = jnp.asarray([t], dtype=f32)

    kernel = functools.partial(_inversed_dynamics_kernel,
                               d_actual=D, t_max=float(t_max))

    cost = pl.CostEstimate(
        flops=2 * B_pad * (D_in * H_pad + H_pad * OUT_W) + B_pad * H_pad * 3,
        transcendentals=B_pad * H_pad,
        bytes_accessed=(xp.size * 2 + w1p.size * 2 + w2p.size * 2
                        + (b1p.size + btp.size + b2p.size) * 4
                        + B_pad * OUT_W * 4),
    )

    out = pl.pallas_call(
        kernel,
        out_shape=jax.ShapeDtypeStruct((B_pad, OUT_W), f32),
        grid_spec=pltpu.PrefetchScalarGridSpec(
            num_scalar_prefetch=1,                 # t lives in SMEM
            grid=(nb,),
            in_specs=[
                pl.BlockSpec((TB, D_in), lambda i, t: (i, 0)),      # x tile
                pl.BlockSpec((D_in, H_pad), lambda i, t: (0, 0)),   # W1 (resident)
                pl.BlockSpec((1, H_pad), lambda i, t: (0, 0)),      # b1 (resident)
                pl.BlockSpec((1, H_pad), lambda i, t: (0, 0)),      # bt (resident)
                pl.BlockSpec((H_pad, OUT_W), lambda i, t: (0, 0)),  # W2 (resident)
                pl.BlockSpec((1, OUT_W), lambda i, t: (0, 0)),      # b2 (resident)
            ],
            out_specs=pl.BlockSpec((TB, OUT_W), lambda i, t: (i, 0)),
        ),
        compiler_params=pltpu.CompilerParams(
            dimension_semantics=("parallel",),
            vmem_limit_bytes=48 * 1024 * 1024,
        ),
        cost_estimate=cost,
    )(t_arr, xp, w1p, b1p, btp, w2p, b2p)

    dx = out[:B, :D]
    trace = out[:B, D:D + 1]
    return [dx, trace]


def _reference_bf16(t, x, w1, b1, bt, w2, b2):
    # Reference matching the kernel's numerics (bf16 MXU inputs, f32 accumulation).
    t_rev = T_MAX - t
    xb, w1b, w2b = (a.astype(jnp.bfloat16) for a in (x, w1, w2))
    pre = jnp.dot(xb, w1b, preferred_element_type=jnp.float32) + b1 + t_rev * bt
    h = jnp.tanh(pre)
    dx = jnp.dot(h.astype(jnp.bfloat16), w2b, preferred_element_type=jnp.float32) + b2
    s = jnp.sum(w1b.astype(jnp.float32) * w2b.astype(jnp.float32).T, axis=0)
    trace = jnp.sum((1.0 - h * h) * s, axis=-1, keepdims=True)
    return [-dx, -trace]


def _reference_f32(t, x, w1, b1, bt, w2, b2):
    t_rev = T_MAX - t
    h = jnp.tanh(x @ w1 + b1 + t_rev * bt)
    dx = h @ w2 + b2
    s = jnp.sum(w1 * w2.T, axis=0)
    trace = jnp.sum((1.0 - h * h) * s, axis=-1, keepdims=True)
    return [-dx, -trace]


if __name__ == "__main__":
    B, D, H = 8, 16, 32

    key = jax.random.PRNGKey(0)
    k_x, k_w1, k_b1, k_bt, k_w2, k_b2 = jax.random.split(key, 6)

    x = jax.random.normal(k_x, (B, D), dtype=jnp.float32)
    w1 = jax.random.normal(k_w1, (D, H), dtype=jnp.float32) * 0.1
    b1 = jax.random.normal(k_b1, (H,), dtype=jnp.float32) * 0.1
    bt = jax.random.normal(k_bt, (H,), dtype=jnp.float32) * 0.1
    w2 = jax.random.normal(k_w2, (H, D), dtype=jnp.float32) * 0.1
    b2 = jax.random.normal(k_b2, (D,), dtype=jnp.float32) * 0.1

    t = 0.3

    dx, trace = inversed_dynamics(t, x, w1, b1, bt, w2, b2)
    jax.block_until_ready(dx)
    jax.block_until_ready(trace)

    # Tight check vs a reference using the same bf16 matmul operands.
    dx_ref, trace_ref = _reference_bf16(t, x, w1, b1, bt, w2, b2)
    assert jnp.allclose(dx, dx_ref, atol=1e-3, rtol=1e-3)
    assert jnp.allclose(trace, trace_ref, atol=1e-3, rtol=1e-3)

    # Loose sanity check vs the pure-f32 module semantics.
    dx_f32, trace_f32 = _reference_f32(t, x, w1, b1, bt, w2, b2)
    assert jnp.allclose(dx, dx_f32, atol=5e-2, rtol=5e-2)
    assert jnp.allclose(trace, trace_f32, atol=5e-2, rtol=5e-2)

    print("KERNEL_OK")
</pallas_src>

<mosaic_0001>
module attributes {stable_mosaic.version = 11 : i64} {
  func.func @_inversed_dynamics_kernel(%arg0: i32, %arg1: memref<1xf32, #tpu.memory_space<smem>>, %arg2: memref<8x128xbf16, #tpu.memory_space<vmem>>, %arg3: memref<128x128xbf16, #tpu.memory_space<vmem>>, %arg4: memref<1x128xf32, #tpu.memory_space<vmem>>, %arg5: memref<1x128xf32, #tpu.memory_space<vmem>>, %arg6: memref<128x128xbf16, #tpu.memory_space<vmem>>, %arg7: memref<1x128xf32, #tpu.memory_space<vmem>>, %arg8: memref<8x128xf32, #tpu.memory_space<vmem>>) attributes {dimension_semantics = [#tpu.dimension_semantics<parallel>], iteration_bounds = array<i64: 1>, scalar_prefetch = 1 : i64, scratch_operands = 0 : i64, tpu.core_type = #tpu.core_type<tc>, window_params = [{transform_indices = @transform_0, window_bounds = array<i64: 8, 128>}, {pipeline_mode = #tpu.pipeline_mode<synchronous>, transform_indices = @transform_1, window_bounds = array<i64: 128, 128>}, {pipeline_mode = #tpu.pipeline_mode<synchronous>, transform_indices = @transform_2, window_bounds = array<i64: 1, 128>}, {pipeline_mode = #tpu.pipeline_mode<synchronous>, transform_indices = @transform_3, window_bounds = array<i64: 1, 128>}, {pipeline_mode = #tpu.pipeline_mode<synchronous>, transform_indices = @transform_4, window_bounds = array<i64: 128, 128>}, {pipeline_mode = #tpu.pipeline_mode<synchronous>, transform_indices = @transform_5, window_bounds = array<i64: 1, 128>}, {transform_indices = @transform_6, window_bounds = array<i64: 8, 128>}]} {
    %c0 = arith.constant 0 : index
    %0 = memref.load %arg1[%c0] : memref<1xf32, #tpu.memory_space<smem>>
    %cst = arith.constant 1.000000e+00 : f32
    %1 = arith.subf %cst, %0 : f32
    %c0_0 = arith.constant 0 : index
    %c0_1 = arith.constant 0 : index
    %2 = vector.load %arg2[%c0_0, %c0_1] : memref<8x128xbf16, #tpu.memory_space<vmem>>, vector<8x128xbf16>
    %c0_2 = arith.constant 0 : index
    %c0_3 = arith.constant 0 : index
    %3 = vector.load %arg3[%c0_2, %c0_3] : memref<128x128xbf16, #tpu.memory_space<vmem>>, vector<128x128xbf16>
    %c0_4 = arith.constant 0 : index
    %c0_5 = arith.constant 0 : index
    %4 = vector.load %arg6[%c0_4, %c0_5] : memref<128x128xbf16, #tpu.memory_space<vmem>>, vector<128x128xbf16>
    %cst_6 = arith.constant dense<0.000000e+00> : vector<8x128xf32>
    %5 = tpu.matmul %2, %3, %cst_6 {dimension_numbers = #tpu.dot_dimension_numbers<[1], [0], [0], [1], [0, 0, 1, 1], [], []>} : vector<8x128xbf16>, vector<128x128xbf16>, vector<8x128xf32> -> vector<8x128xf32>
    %c0_7 = arith.constant 0 : index
    %c0_8 = arith.constant 0 : index
    %6 = vector.load %arg4[%c0_7, %c0_8] : memref<1x128xf32, #tpu.memory_space<vmem>>, vector<1x128xf32>
    %7 = vector.broadcast %6 : vector<1x128xf32> to vector<8x128xf32>
    %8 = arith.addf %5, %7 : vector<8x128xf32>
    %c0_9 = arith.constant 0 : index
    %c0_10 = arith.constant 0 : index
    %9 = vector.load %arg5[%c0_9, %c0_10] : memref<1x128xf32, #tpu.memory_space<vmem>>, vector<1x128xf32>
    %10 = vector.broadcast %1 : f32 to vector<1x128xf32>
    %11 = arith.mulf %10, %9 : vector<1x128xf32>
    %12 = vector.broadcast %11 : vector<1x128xf32> to vector<8x128xf32>
    %13 = arith.addf %8, %12 : vector<8x128xf32>
    %14 = math.tanh %13 : vector<8x128xf32>
    %15 = arith.truncf %14 : vector<8x128xf32> to vector<8x128xbf16>
    %cst_11 = arith.constant dense<0.000000e+00> : vector<8x128xf32>
    %16 = tpu.matmul %15, %4, %cst_11 {dimension_numbers = #tpu.dot_dimension_numbers<[1], [0], [0], [1], [0, 0, 1, 1], [], []>} : vector<8x128xbf16>, vector<128x128xbf16>, vector<8x128xf32> -> vector<8x128xf32>
    %c0_12 = arith.constant 0 : index
    %c0_13 = arith.constant 0 : index
    %17 = vector.load %arg7[%c0_12, %c0_13] : memref<1x128xf32, #tpu.memory_space<vmem>>, vector<1x128xf32>
    %18 = vector.broadcast %17 : vector<1x128xf32> to vector<8x128xf32>
    %19 = arith.addf %16, %18 : vector<8x128xf32>
    %20 = arith.extf %3 : vector<128x128xbf16> to vector<128x128xf32>
    %21 = arith.extf %4 : vector<128x128xbf16> to vector<128x128xf32>
    %22 = tpu.transpose %21, [1, 0] : vector<128x128xf32> -> vector<128x128xf32>
    %23 = arith.mulf %20, %22 : vector<128x128xf32>
    %cst_14 = arith.constant dense<0.000000e+00> : vector<128xf32>
    %24 = vector.multi_reduction <add>, %23, %cst_14 [0] : vector<128x128xf32> to vector<128xf32>
    %25 = vector.shape_cast %24 : vector<128xf32> to vector<1x128xf32>
    %26 = arith.mulf %14, %14 : vector<8x128xf32>
    %cst_15 = arith.constant 1.000000e+00 : f32
    %27 = vector.broadcast %cst_15 : f32 to vector<8x128xf32>
    %28 = arith.subf %27, %26 : vector<8x128xf32>
    %29 = vector.broadcast %25 : vector<1x128xf32> to vector<8x128xf32>
    %30 = arith.mulf %28, %29 : vector<8x128xf32>
    %cst_16 = arith.constant dense<0.000000e+00> : vector<8xf32>
    %31 = vector.multi_reduction <add>, %30, %cst_16 [1] : vector<8x128xf32> to vector<8xf32>
    %32 = vector.shape_cast %31 : vector<8xf32> to vector<8x1xf32>
    %33 = tpu.iota {dimensions = array<i32: 1>} : vector<1x128xi32>
    %c16_i32 = arith.constant 16 : i32
    %34 = vector.broadcast %c16_i32 : i32 to vector<1x128xi32>
    %35 = arith.cmpi eq, %33, %34 : vector<1x128xi32>
    %36 = arith.extui %35 : vector<1x128xi1> to vector<1x128xi32>
    %37 = arith.sitofp %36 : vector<1x128xi32> to vector<1x128xf32>
    %38 = vector.broadcast %32 : vector<8x1xf32> to vector<8x128xf32>
    %39 = vector.broadcast %37 : vector<1x128xf32> to vector<8x128xf32>
    %40 = arith.mulf %38, %39 : vector<8x128xf32>
    %41 = arith.addf %19, %40 : vector<8x128xf32>
    %cst_17 = arith.constant 0.000000e+00 : f32
    %42 = vector.broadcast %cst_17 : f32 to vector<8x128xf32>
    %43 = arith.subf %42, %41 : vector<8x128xf32>
    %c0_18 = arith.constant 0 : index
    %c0_19 = arith.constant 0 : index
    %44 = vector.load %arg8[%c0_18, %c0_19] : memref<8x128xf32, #tpu.memory_space<vmem>>, vector<8x128xf32>
    tpu.vector_store %arg8[%c0_18, %c0_19], %43 {strides = array<i32>} : memref<8x128xf32, #tpu.memory_space<vmem>>, vector<8x128xf32>,
    return
  }
  func.func @transform_0(%arg0: i32, %arg1: memref<1xf32, #tpu.memory_space<smem>>) -> (i32, i32) {
    %c0_i32 = arith.constant 0 : i32
    %c0_i32_0 = arith.constant 0 : i32
    return %arg0, %c0_i32 : i32, i32
  }
  func.func @transform_1(%arg0: i32, %arg1: memref<1xf32, #tpu.memory_space<smem>>) -> (i32, i32) {
    %c0_i32 = arith.constant 0 : i32
    %c0_i32_0 = arith.constant 0 : i32
    %c0_i32_1 = arith.constant 0 : i32
    return %c0_i32, %c0_i32_0 : i32, i32
  }
  func.func @transform_2(%arg0: i32, %arg1: memref<1xf32, #tpu.memory_space<smem>>) -> (i32, i32) {
    %c0_i32 = arith.constant 0 : i32
    %c0_i32_0 = arith.constant 0 : i32
    %c0_i32_1 = arith.constant 0 : i32
    return %c0_i32, %c0_i32_0 : i32, i32
  }
  func.func @transform_3(%arg0: i32, %arg1: memref<1xf32, #tpu.memory_space<smem>>) -> (i32, i32) {
    %c0_i32 = arith.constant 0 : i32
    %c0_i32_0 = arith.constant 0 : i32
    %c0_i32_1 = arith.constant 0 : i32
    return %c0_i32, %c0_i32_0 : i32, i32
  }
  func.func @transform_4(%arg0: i32, %arg1: memref<1xf32, #tpu.memory_space<smem>>) -> (i32, i32) {
    %c0_i32 = arith.constant 0 : i32
    %c0_i32_0 = arith.constant 0 : i32
    %c0_i32_1 = arith.constant 0 : i32
    return %c0_i32, %c0_i32_0 : i32, i32
  }
  func.func @transform_5(%arg0: i32, %arg1: memref<1xf32, #tpu.memory_space<smem>>) -> (i32, i32) {
    %c0_i32 = arith.constant 0 : i32
    %c0_i32_0 = arith.constant 0 : i32
    %c0_i32_1 = arith.constant 0 : i32
    return %c0_i32, %c0_i32_0 : i32, i32
  }
  func.func @transform_6(%arg0: i32, %arg1: memref<1xf32, #tpu.memory_space<smem>>) -> (i32, i32) {
    %c0_i32 = arith.constant 0 : i32
    %c0_i32_0 = arith.constant 0 : i32
    return %arg0, %c0_i32 : i32, i32
  }
}

</mosaic_0001>

<bundles_post_ra>
// kernel: tpu_custom_call.1
= control target key start
LH: loop header
LB: loop body
LE: loop exit
PB: predicated region body
PF: predicated region fallthrough
CT: control target
= control target key end

     0   :  { %13 = vsyncpa [#allocation5], 0  ;;  %s820_s0 = inlined_call_operand.<no memory space> [shape: f32[1], index: 0, kind: input, shape index: {}]   ;;  %s821_s1 = inlined_call_operand.hbm [shape: bf16[8,128], index: 1, kind: input, shape index: {}]   ;;  %s822_s2 = inlined_call_operand.hbm [shape: bf16[128,128], index: 2, kind: input, shape index: {}]   ;;  %s823_s3 = inlined_call_operand.vmem [shape: f32[1,128], index: 3, kind: input, shape index: {}]   ;;  %s824_s4 = inlined_call_operand.vmem [shape: f32[1,128], index: 4, kind: input, shape index: {}]   ;;  %s825_s5 = inlined_call_operand.hbm [shape: bf16[128,128], index: 5, kind: input, shape index: {}]   ;;  %s826_s6 = inlined_call_operand.vmem [shape: f32[1,128], index: 6, kind: input, shape index: {}]   ;;  %s827_s7 = inlined_call_operand.hbm [shape: f32[8,128], index: 7, kind: output, shape index: {}]  }
   0x1   :  { %14 = vsyncpa [#allocation8], 0 }
   0x2   :  { %15 = vsyncpa [#allocation6], 0  ;;  %s647_s24 = smov [#allocation7]   ;;  %s553_s28 = scalar_lea.hbm %s822_s2, 1024 }
   0x3   :  { %s31_s25 = sshll.u32 %s647_s24, 4  ;;  %p554_p0 = scmp.ne.s32.totalorder %s822_s2, %s553_s28  ;;  %s32_s25 = int_to_ptr.vmem [resolvable:$true] %s31_s25 }
   0x4   :  { %p557_p1 = scmp.lt.u32.totalorder %s553_s28, %s822_s2 }
   0x6   :  { %p559_p2 = pnand %p557_p1, %p554_p0 }
   0x8   :  { %562 = shalt.err (!%p559_p2)
}
   0x9   :  { %s563_s10 = scalar_lea.vmem %s32_s25, 1024  ;;  %p568_p4 = scmp.lt.s32.totalorder %s32_s25, %s32_s25 }
   0xa   :  { %p564_p3 = scmp.ne.s32.totalorder %s32_s25, %s563_s10  ;;  %p569_p5 = scmp.lt.s32.totalorder %s563_s10, %s563_s10 }
   0xc   :  { %p570_p6 = por %p569_p5, %p568_p4 }
   0xe   :  { %p571_p7 = pnand %p570_p6, %p564_p3 }
  0x10   :  { %574 = shalt.err (!%p571_p7)
}
  0x11   :  { %s648_s11 = smov 64   ;;  %s649_s12 = smov 4  }
  0x12   :  { %37 = dma.hbm_to_vmem [thread:$0]  %s822_s2, 1024, %s32_s25, [#allocation8], %s648_s11, %s648_s11, %s649_s12  }
  0x13   :  { %s650_s15 = smov [#allocation4]   ;;  %s651_s17 = smov [#allocation9]  }
  0x14   :  { %s22_s16 = sshll.u32 %s650_s15, 4  ;;  %s47_s18 = sshll.u32 %s651_s17, 4  ;;  %s23_s16 = int_to_ptr.vmem [resolvable:$true] %s22_s16  ;;  %s48_s18 = int_to_ptr.vmem [resolvable:$true] %s47_s18 }
  0x15   :  { %s575_s21 = scalar_lea.hbm %s821_s1, 64 }
  0x16   :  { %p576_p8 = scmp.ne.s32.totalorder %s821_s1, %s575_s21  ;;  %p579_p9 = scmp.lt.u32.totalorder %s575_s21, %s821_s1 }
  0x18   :  { %p581_p10 = pnand %p579_p9, %p576_p8 }
  0x1a   :  { %584 = shalt.err (!%p581_p10)
}
  0x1b   :  { %s585_s2 = scalar_lea.vmem %s23_s16, 64  ;;  %p590_p12 = scmp.lt.s32.totalorder %s23_s16, %s23_s16 }
  0x1c   :  { %p586_p11 = scmp.ne.s32.totalorder %s23_s16, %s585_s2  ;;  %p591_p13 = scmp.lt.s32.totalorder %s585_s2, %s585_s2 }
  0x1e   :  { %p592_p0 = por %p591_p13, %p590_p12 }
  0x20   :  { %p593_p1 = pnand %p592_p0, %p586_p11 }
  0x22   :  { %596 = shalt.err (!%p593_p1)
}
  0x23   :  { %25 = dma.hbm_to_vmem [thread:$0]  %s821_s1, 64, %s23_s16, [#allocation5]  }
  0x24   :  { %s597_s30 = scalar_lea.hbm %s825_s5, 1024 }
  0x25   :  { %p598_p2 = scmp.ne.s32.totalorder %s825_s5, %s597_s30  ;;  %p601_p3 = scmp.lt.u32.totalorder %s597_s30, %s825_s5 }
  0x27   :  { %p603_p4 = pnand %p601_p3, %p598_p2 }
  0x29   :  { %606 = shalt.err (!%p603_p4)
}
  0x2a   :  { %s607_s14 = scalar_lea.vmem %s48_s18, 1024  ;;  %p612_p6 = scmp.lt.s32.totalorder %s48_s18, %s48_s18 }
  0x2b   :  { %p608_p5 = scmp.ne.s32.totalorder %s48_s18, %s607_s14  ;;  %p613_p7 = scmp.lt.s32.totalorder %s607_s14, %s607_s14 }
  0x2d   :  { %p614_p8 = por %p613_p7, %p612_p6 }
  0x2f   :  { %p615_p9 = pnand %p614_p8, %p608_p5 }
  0x31   :  { %618 = shalt.err (!%p615_p9)
}
  0x32   :  { %53 = dma.hbm_to_vmem [thread:$0]  %s825_s5, 1024, %s48_s18, [#allocation8], %s648_s11, %s648_s11, %s649_s12  }
  0x33   :  { %641 = dma.done.wait [#allocation5], 64  }
  0x34   :  { %642 = vsyncadd [#allocation5], 4294967232 }
  0x35   :  { %643 = dma.done.wait [#allocation8], 2048  }
  0x36   :  { %644 = vsyncadd [#allocation8], 4294965248  ;;  %v652_v0 = vmov 0.0   ;;  %vm653_vm0 = vmmov 0   ;;  %v741_v1 = vld [vmem:[#allocation7] sm:$0xff]   ;;  %v743_v2 = vld [vmem:[#allocation7 + $0x8] sm:$0xff]  }
  0x37   :  { %471 = vmatprep.subr.bf16.mxu0 %v652_v0  ;;  %487 = vmatprep.mubr.msk.bf16.mxu0 %vm653_vm0, %v652_v0  ;;  %v85_v3 = vld [vmem:[#allocation9] sm:$0xff]   ;;  %v747_v4 = vld [vmem:[#allocation7 + $0x10] sm:$0xff]   ;;  %v87_v7 = vld [vmem:[#allocation9 + $0x8] sm:$0xff]   ;;  %v303_v34 = vunpack.c.l.bf16 %v741_v1  ;;  %v304_v36 = vunpack.c.h.bf16 %v741_v1  ;;  %v305_v40 = vunpack.c.l.bf16 %v743_v2  ;;  %v306_v44 = vunpack.c.h.bf16 %v743_v2  ;;  %s67_s12 = ssub.f32 1.0, %s820_s0 }
  0x38   :  { %491 = vmatprep.subr.bf16.mxu1 %v652_v0  ;;  %507 = vmatprep.mubr.msk.bf16.mxu1 %vm653_vm0, %v652_v0  ;;  %v319_v5 = vunpack.c.l.bf16 %v85_v3  ;;  %v320_v6 = vunpack.c.h.bf16 %v85_v3  ;;  %v751_v8 = vld [vmem:[#allocation7 + $0x18] sm:$0xff]   ;;  %v321_v9 = vunpack.c.l.bf16 %v87_v7  ;;  %v755_v10 = vld [vmem:[#allocation7 + $0x20] sm:$0xff]   ;;  %v322_v11 = vunpack.c.h.bf16 %v87_v7  ;;  %v89_v12 = vld [vmem:[#allocation9 + $0x10] sm:$0xff]  }
  0x39   :  { %472 = vmatpush3.bf16.msra.mxu0 %v741_v1  ;;  %v759_v13 = vld [vmem:[#allocation7 + $0x28] sm:$0xff]   ;;  %v323_v14 = vunpack.c.l.bf16 %v89_v12  ;;  %v763_v15 = vld [vmem:[#allocation7 + $0x30] sm:$0xff]   ;;  %v324_v16 = vunpack.c.h.bf16 %v89_v12  ;;  %v91_v17 = vld [vmem:[#allocation9 + $0x18] sm:$0xff]   ;;  %492 = vmatpush3.bf16.msra.mxu1 %v85_v3  ;;  %v307_v48 = vunpack.c.l.bf16 %v747_v4  ;;  %v308_v52 = vunpack.c.h.bf16 %v747_v4 }
  0x3a   :  { %473 = vmatprep.subr.bf16.mxu0 %v652_v0  ;;  %335 = vxpose.xlu0.b32.start [1/16] %v319_v5, 128  ;;  %v767_v18 = vld [vmem:[#allocation7 + $0x38] sm:$0xff]   ;;  %v325_v19 = vunpack.c.l.bf16 %v91_v17  ;;  %v326_v20 = vunpack.c.h.bf16 %v91_v17  ;;  %v93_v22 = vld [vmem:[#allocation9 + $0x20] sm:$0xff]   ;;  %v95_v25 = vld [vmem:[#allocation9 + $0x28] sm:$0xff]   ;;  %v309_v56 = vunpack.c.l.bf16 %v751_v8  ;;  %v310_v60 = vunpack.c.h.bf16 %v751_v8 }
  0x3b   :  { %v68_v21 = vld [vmem:[#allocation4] sm:$0xf]  ;;  %v327_v23 = vunpack.c.l.bf16 %v93_v22  ;;  %v328_v24 = vunpack.c.h.bf16 %v93_v22  ;;  %v329_v26 = vunpack.c.l.bf16 %v95_v25  ;;  %v330_v27 = vunpack.c.h.bf16 %v95_v25  ;;  %v97_v28 = vld [vmem:[#allocation9 + $0x30] sm:$0xff]   ;;  %493 = vmatprep.subr.bf16.mxu1 %v652_v0 }
  0x3c   :  { %v331_v29 = vunpack.c.l.bf16 %v97_v28  ;;  %v332_v30 = vunpack.c.h.bf16 %v97_v28  ;;  %v99_v31 = vld [vmem:[#allocation9 + $0x38] sm:$0xff]   ;;  %v311_v1 = vunpack.c.l.bf16 %v755_v10 }
  0x3d   :  { %474 = vmatpush3.bf16.msra.mxu0 %v743_v2  ;;  %v333_v32 = vunpack.c.l.bf16 %v99_v31  ;;  %494 = vmatpush3.bf16.msra.mxu1 %v87_v7  ;;  %v334_v33 = vunpack.c.h.bf16 %v99_v31 }
  0x3e   :  { %475 = vmatprep.subr.bf16.mxu0 %v652_v0  ;;  %336 = vxpose.xlu0.b32.cont [2/16] %v320_v6, 128 }
  0x3f   :  { %495 = vmatprep.subr.bf16.mxu1 %v652_v0 }
  0x41   :  { %476 = vmatpush3.bf16.msra.mxu0 %v747_v4  ;;  %496 = vmatpush3.bf16.msra.mxu1 %v89_v12  ;;  %v312_v4 = vunpack.c.h.bf16 %v755_v10 }
  0x42   :  { %477 = vmatprep.subr.bf16.mxu0 %v652_v0  ;;  %337 = vxpose.xlu0.b32.cont [3/16] %v321_v9, 128 }
  0x43   :  { %497 = vmatprep.subr.bf16.mxu1 %v652_v0 }
  0x45   :  { %478 = vmatpush3.bf16.msra.mxu0 %v751_v8  ;;  %498 = vmatpush3.bf16.msra.mxu1 %v91_v17  ;;  %v314_v8 = vunpack.c.h.bf16 %v759_v13 }
  0x46   :  { %479 = vmatprep.subr.bf16.mxu0 %v652_v0  ;;  %338 = vxpose.xlu0.b32.cont [4/16] %v322_v11, 128  ;;  %v313_v11 = vunpack.c.l.bf16 %v759_v13 }
  0x47   :  { %499 = vmatprep.subr.bf16.mxu1 %v652_v0 }
  0x49   :  { %480 = vmatpush3.bf16.msra.mxu0 %v755_v10  ;;  %500 = vmatpush3.bf16.msra.mxu1 %v93_v22  ;;  %v316_v10 = vunpack.c.h.bf16 %v763_v15 }
  0x4a   :  { %481 = vmatprep.subr.bf16.mxu0 %v652_v0  ;;  %339 = vxpose.xlu0.b32.cont [5/16] %v323_v14, 128 }
  0x4b   :  { %501 = vmatprep.subr.bf16.mxu1 %v652_v0 }
  0x4d   :  { %482 = vmatpush3.bf16.msra.mxu0 %v759_v13  ;;  %502 = vmatpush3.bf16.msra.mxu1 %v95_v25  ;;  %v318_v13 = vunpack.c.h.bf16 %v767_v18 }
  0x4e   :  { %483 = vmatprep.subr.bf16.mxu0 %v652_v0  ;;  %340 = vxpose.xlu0.b32.cont [6/16] %v324_v16, 128 }
  0x4f   :  { %503 = vmatprep.subr.bf16.mxu1 %v652_v0 }
  0x51   :  { %484 = vmatpush3.bf16.msra.mxu0 %v763_v15  ;;  %504 = vmatpush3.bf16.msra.mxu1 %v97_v28 }
  0x52   :  { %485 = vmatprep.subr.bf16.mxu0 %v652_v0  ;;  %341 = vxpose.xlu0.b32.cont [7/16] %v325_v19, 128 }
  0x53   :  { %505 = vmatprep.subr.bf16.mxu1 %v652_v0 }
  0x55   :  { %486 = vmatpush3.bf16.msra.mxu0 %v767_v18  ;;  %506 = vmatpush3.bf16.msra.mxu1 %v99_v31 }
  0x56   :  { %342 = vxpose.xlu0.b32.cont [8/16] %v326_v20, 128 }
  0x58   :  { %488 = vmatmul.mubr.bf16.vlgmr.msra.gmra.mrb[0].mxu0 %v68_v21  ;;  %v315_v21 = vunpack.c.l.bf16 %v763_v15  ;;  %v196_v15 = vld [vmem:[%s824_s4] sm:$0x1]  ;;  %s654_s4 = smov [#allocation10]  }
  0x59   :  { %s424_s20 = sshll.u32 %s654_s4, 4  ;;  %s425_s20 = int_to_ptr.vmem [resolvable:$true] %s424_s20 }
  0x5a   :  { %343 = vxpose.xlu0.b32.cont [9/16] %v327_v23, 128  ;;  %s619_s21 = scalar_lea.vmem %s425_s20, 128  ;;  %p624_p11 = scmp.lt.s32.totalorder %s425_s20, %s425_s20 }
  0x5b   :  { %p620_p10 = scmp.ne.s32.totalorder %s425_s20, %s619_s21  ;;  %p625_p12 = scmp.lt.s32.totalorder %s619_s21, %s619_s21 }
  0x5d   :  { %p626_p13 = por %p625_p12, %p624_p11 }
  0x5e   :  { %344 = vxpose.xlu0.b32.cont [10/16] %v328_v24, 128 }
  0x5f   :  { %p627_p0 = pnand %p626_p13, %p620_p10 }
  0x62   :  { %345 = vxpose.xlu0.b32.cont [11/16] %v329_v26, 128 }
  0x66   :  { %346 = vxpose.xlu0.b32.cont [12/16] %v330_v27, 128 }
  0x6a   :  { %347 = vxpose.xlu0.b32.cont [13/16] %v331_v29, 128 }
  0x6e   :  { %348 = vxpose.xlu0.b32.cont [14/16] %v332_v30, 128  ;;  %v317_v30 = vunpack.c.l.bf16 %v767_v18  ;;  %v434_v18 = vld [vmem:[%s823_s3] ss:$0 sm:$0xff] }
  0x72   :  { %349 = vxpose.xlu0.b32.cont [15/16] %v333_v32, 128 }
  0x76   :  { %350 = vxpose.xlu0.b32.end [16/16] %v334_v33, 128  ;;  %v200_v33 = vlaneseq }
  0xba   :  { %v351_v35 = vpop.trf.xlu0 }
  0xbb   :  { %v367_v37 = vmul.f32 %v351_v35, %v303_v34 }
  0xbe   :  { %v352_v38 = vpop.trf.xlu0 }
  0xbf   :  { %v368_v39 = vmul.f32 %v352_v38, %v304_v36  ;;  %v201_v36 = vshrl.u32 %v200_v33, 7 }
  0xc1   :  { %v383_v41 = vadd.f32 %v368_v39, %v367_v37  ;;  %v197_v37 = vstv %s67_s12 }
  0xc2   :  { %v353_v42 = vpop.trf.xlu0  ;;  %v198_v39 = vmul.f32 %v197_v37, %v196_v15 }
  0xc3   :  { %v369_v43 = vmul.f32 %v353_v42, %v305_v40  ;;  %v202_v40 = vsub.s32 0, %v201_v36 }
  0xc5   :  { %v384_v45 = vadd.f32 %v383_v41, %v369_v43  ;;  %v203_v42 = vrot.slane %v198_v39, %v202_v40 }
  0xc6   :  { %v354_v46 = vpop.trf.xlu0 }
  0xc7   :  { %v370_v47 = vmul.f32 %v354_v46, %v306_v44 }
  0xc9   :  { %v385_v49 = vadd.f32 %v384_v45, %v370_v47 }
  0xca   :  { %v355_v50 = vpop.trf.xlu0 }
  0xcb   :  { %v371_v51 = vmul.f32 %v355_v50, %v307_v48 }
  0xcd   :  { %v386_v53 = vadd.f32 %v385_v49, %v371_v51 }
  0xce   :  { %v356_v54 = vpop.trf.xlu0 }
  0xcf   :  { %v372_v55 = vmul.f32 %v356_v54, %v308_v52 }
  0xd1   :  { %v387_v57 = vadd.f32 %v386_v53, %v372_v55 }
  0xd2   :  { %v357_v58 = vpop.trf.xlu0 }
  0xd3   :  { %v373_v59 = vmul.f32 %v357_v58, %v309_v56 }
  0xd5   :  { %v388_v61 = vadd.f32 %v387_v57, %v373_v59  ;;  %v410_v59 = vand.u32 127, %v200_v33 }
  0xd6   :  { %v358_v62 = vpop.trf.xlu0 }
  0xd7   :  { %v374_v63 = vmul.f32 %v358_v62, %v310_v60  ;;  %vm411_vm1 = vcmp.eq.s32.totalorder %v410_v59, 16  ;;  %v443_v62 = vld [vmem:[%s826_s6] ss:$0 sm:$0xff] }
  0xd8   :  { %v452_v60 = vsel %vm411_vm1, 1.0, %v652_v0 }
  0xd9   :  { %v389_v2 = vadd.f32 %v388_v61, %v374_v63 }
  0xda   :  { %v359_v3 = vpop.trf.xlu0 }
  0xdb   :  { %v375_v5 = vmul.f32 %v359_v3, %v311_v1 }
  0xdd   :  { %v390_v6 = vadd.f32 %v389_v2, %v375_v5 }
  0xde   :  { %v360_v7 = vpop.trf.xlu0 }
  0xdf   :  { %v376_v9 = vmul.f32 %v360_v7, %v312_v4 }
  0xe1   :  { %v391_v12 = vadd.f32 %v390_v6, %v376_v9 }
  0xe2   :  { %v361_v14 = vpop.trf.xlu0 }
  0xe3   :  { %v377_v16 = vmul.f32 %v361_v14, %v313_v11 }
  0xe5   :  { %v392_v17 = vadd.f32 %v391_v12, %v377_v16 }
  0xe6   :  { %v362_v19 = vpop.trf.xlu0 }
  0xe7   :  { %v378_v20 = vmul.f32 %v362_v19, %v314_v8 }
  0xe9   :  { %v393_v22 = vadd.f32 %v392_v17, %v378_v20 }
  0xea   :  { %v363_v23 = vpop.trf.xlu0 }
  0xeb   :  { %v379_v24 = vmul.f32 %v363_v23, %v315_v21 }
  0xed   :  { %v394_v25 = vadd.f32 %v393_v22, %v379_v24 }
  0xee   :  { %v364_v26 = vpop.trf.xlu0 }
  0xef   :  { %v380_v27 = vmul.f32 %v364_v26, %v316_v10 }
  0xf1   :  { %v395_v28 = vadd.f32 %v394_v25, %v380_v27 }
  0xf2   :  { %v365_v29 = vpop.trf.xlu0 }
  0xf3   :  { %v381_v31 = vmul.f32 %v365_v29, %v317_v30 }
  0xf5   :  { %v396_v34 = vadd.f32 %v395_v28, %v381_v31 }
  0xf6   :  { %v366_v32 = vpop.trf.xlu0 }
  0xf7   :  { %v382_v35 = vmul.f32 %v366_v32, %v318_v13 }
  0xf9   :  { %v397_v38 = vadd.f32 %v396_v34, %v382_v35 }
  0xfb   :  { %v398_v41 = vrot.slane %v397_v38, 4 }
  0xfd   :  { %v399_v44 = vadd.f32 %v398_v41, %v397_v38 }
  0xff   :  { %v400_v50 = vrot.slane %v399_v44, 2 }
 0x101   :  { %v401_v51 = vadd.f32 %v400_v50, %v399_v44 }
 0x103   :  { %v402_v52 = vrot.slane %v401_v51, 1 }
 0x105   :  { %v403_v55 = vadd.f32 %v402_v52, %v401_v51 }
 0x12b   :  { %v190_v43 = vpop.f32.mrb[0].mxu0 }
 0x12c   :  { %v191_v45 = vadd.f32 %v434_v18, %v190_v43  ;;  %v489_v46 = vpop.f32.mrb[1].mxu0 }
 0x12d   :  { %v193_v47 = vpop.f32.mrb[2].mxu0 }
 0x12e   :  { %v205_v48 = vadd.f32 %v203_v42, %v191_v45  ;;  %v490_v49 = vpop.f32.mrb[3].mxu0 }
 0x130   :  { %551 = vtanh.f32 %v205_v48 }
 0x13a   :  { %v552_v53 = vpop.eup %551 }
 0x13b   :  { %v207_v54 = vpack.c.bf16 %v552_v53, %v552_v53  ;;  %v404_v56 = vmul.f32 %v552_v53, %v552_v53 }
 0x13d   :  { %508 = vmatmul.mubr.bf16.vlgmr.msra.gmra.mrb[0].mxu1 %v207_v54  ;;  %v405_v57 = vsub.f32 1.0, %v404_v56 }
 0x13f   :  { %v406_v58 = vmul.f32 %v405_v57, %v403_v55 }
 0x141   :  { %407 = vadd.xlane.f32.xlu1 %v406_v58 }
 0x1ce   :  { %v408_v61 = vpop.xlane.xlu1 %407 }
 0x1cf   :  { %v414_v1 = vmul.f32 %v452_v60, %v408_v61 }
 0x210   :  { %v297_v63 = vpop.f32.mrb[0].mxu1 }
 0x211   :  { %v298_v2 = vadd.f32 %v443_v62, %v297_v63  ;;  %v509_v3 = vpop.f32.mrb[1].mxu1 }
 0x212   :  { %v300_v5 = vpop.f32.mrb[2].mxu1 }
 0x213   :  { %v415_v4 = vadd.f32 %v414_v1, %v298_v2  ;;  %v510_v6 = vpop.f32.mrb[3].mxu1 }
 0x215   :  { %v416_v7 = vsub.f32 0.0, %v415_v4 }
 0x217   :  { %417 = vst [vmem:[#allocation10] sm:$0xff] %v416_v7 }
 0x218   :  { %630 = shalt.err (!%p627_p0)
}
 0x219   :  { %s631_s23 = scalar_lea.hbm %s827_s7, 128 }
 0x21a   :  { %p632_p1 = scmp.ne.s32.totalorder %s827_s7, %s631_s23  ;;  %p635_p2 = scmp.lt.u32.totalorder %s631_s23, %s827_s7 }
 0x21c   :  { %p637_p3 = pnand %p635_p2, %p632_p1 }
 0x21e   :  { %640 = shalt.err (!%p637_p3)
}
 0x21f   :  { %427 = dma.vmem_to_hbm [thread:$0]  %s425_s20, 128, %s827_s7, [#allocation6]  }
 0x220   :  { %645 = dma.done.wait [#allocation6], 128  }
 0x221   :  { %646 = vsyncadd [#allocation6], 4294967168 }
 0x222   :  { %431 = vsyncpa [#allocation5], 1 }
 0x223   :  { %432 = vsyncpa [#allocation8], 1 }
 0x224   :  { %433 = vsyncpa [#allocation6], 1 }

</bundles_post_ra>
